<compile_context>
chip_gen: v5e
topology: v5e:2x2
jax: 0.10.0
libtpu: 0.0.40
codegen_flags: <defaults>
</compile_context>

<pallas_src>
import math

import jax
import jax.numpy as jnp
from jax import lax
from jax.experimental import pallas as pl
from jax.experimental.pallas import tpu as pltpu

# Per-face packed record (flattened 1-D f32 SMEM table), NFEAT floats/face:
#   [E0x, E0y, E0c,  E1x, E1y, E1c,  Dx, Dy, Dc,  shade]
# normalized barycentric e_i(px,py) = E_ix*px + E_iy*py + E_ic  (1/signed-area
# folded in, so inside <=> e0,e1,(1-e0-e1) all >= 0);
# interpolated depth(px,py) = Dx*px + Dy*py + Dc;  shade = lambert intensity.
NFEAT = 10
# Per-face bbox record (flattened 1-D i32 SMEM table), 4 ints/face:
#   [row_min, row_max, col_min, col_max]   (inclusive, conservative)
NBBOX = 4


def _make_raster_kernel(height, width, base_color):
    """Bakes static image size and the constant base_color into the kernel."""
    br, bg, bb = (float(c) for c in base_color)
    sx = 2.0 / float(width)
    sy = 2.0 / float(height)

    def kernel(face_ref, bbox_ref, out_ref, zbuf, sbuf):
        # face_ref: SMEM (F*NFEAT,) f32.  bbox_ref: SMEM (F*NBBOX,) i32.
        # out_ref:  VMEM (3, TILE_H, TILE_W) f32.
        # zbuf/sbuf: VMEM (TILE_H, TILE_W) f32 scratch (depth / winning shade).
        tile_h = out_ref.shape[1]
        tile_w = out_ref.shape[2]
        num_faces = face_ref.shape[0] // NFEAT

        row0 = pl.program_id(0) * tile_h
        col0 = pl.program_id(1) * tile_w
        rows = (row0 + lax.broadcasted_iota(jnp.int32, (tile_h, tile_w), 0)
                ).astype(jnp.float32)
        cols = (col0 + lax.broadcasted_iota(jnp.int32, (tile_h, tile_w), 1)
                ).astype(jnp.float32)

        # Pixel centers in NDC: x in [-1,1] left->right, y in [-1,1] top = +1.
        px = (cols + 0.5) * sx - 1.0
        py = 1.0 - (rows + 0.5) * sy

        zbuf[...] = jnp.full((tile_h, tile_w), -jnp.inf, jnp.float32)
        sbuf[...] = jnp.zeros((tile_h, tile_w), jnp.float32)

        tile_row_lo = row0
        tile_row_hi = row0 + (tile_h - 1)
        tile_col_lo = col0
        tile_col_hi = col0 + (tile_w - 1)

        @pl.loop(0, num_faces)
        def _(f):
            # Scalar row+column bbox cull: faces that cannot touch this tile
            # cost only a scalar branch (no vector work, no VMEM traffic).
            b4 = NBBOX * f
            row_min = bbox_ref[b4 + 0]
            row_max = bbox_ref[b4 + 1]
            col_min = bbox_ref[b4 + 2]
            col_max = bbox_ref[b4 + 3]
            overlaps = ((row_max >= tile_row_lo) & (row_min <= tile_row_hi)
                        & (col_max >= tile_col_lo) & (col_min <= tile_col_hi))

            @pl.when(overlaps)
            def _():
                base = f * NFEAT
                # Affine edge / depth plane evaluation; edge 2 derived from
                # the barycentric identity e0+e1+e2 == 1.
                e0 = (face_ref[base + 0] * px + face_ref[base + 1] * py
                      + face_ref[base + 2])
                e1 = (face_ref[base + 3] * px + face_ref[base + 4] * py
                      + face_ref[base + 5])
                e2 = 1.0 - e0 - e1
                depth = (face_ref[base + 6] * px + face_ref[base + 7] * py
                         + face_ref[base + 8])

                z_cur = zbuf[...]
                take = ((jnp.minimum(jnp.minimum(e0, e1), e2) >= 0.0)
                        & (depth > z_cur))
                zbuf[...] = jnp.where(take, depth, z_cur)
                sbuf[...] = jnp.where(take, face_ref[base + 9], sbuf[...])

        # Apply the constant base color once per tile (review item #2):
        # per-pixel rgb = shade(winning face) * base_color; background = 0.
        shade = sbuf[...]
        out_ref[0, :, :] = shade * br
        out_ref[1, :, :] = shade * bg
        out_ref[2, :, :] = shade * bb

    return kernel


def _pick_tile(extent, candidates):
    for c in candidates:
        if extent % c == 0:
            return c
    return extent  # full extent is always a legal block size


def rasterize_pallas(face_data, bbox, height, width, base_color):
    """face_data: (F*NFEAT,) f32.  bbox: (F*NBBOX,) i32.  Returns (3,H,W) f32."""
    # Lane axis: prefer 256-lane column tiles, else 128, else full width.
    tile_w = _pick_tile(width, (256, 128))
    # Keep tile_h*tile_w <= 4096 f32 (4 vregs per live temporary) so px/py and
    # the per-face temporaries stay comfortably inside the 64-vreg budget.
    tile_h = _pick_tile(height, (32, 16, 8) if tile_w <= 128 else (16, 8))

    num_faces = face_data.shape[0] // NFEAT
    cost = pl.CostEstimate(
        flops=int(height) * int(width) * int(num_faces) * 20,
        transcendentals=0,
        bytes_accessed=3 * height * width * 4 + num_faces * (NFEAT + NBBOX) * 4,
    )

    kernel = _make_raster_kernel(height, width, base_color)
    return pl.pallas_call(
        kernel,
        out_shape=jax.ShapeDtypeStruct((3, height, width), jnp.float32),
        grid=(height // tile_h, width // tile_w),
        in_specs=[
            pl.BlockSpec(memory_space=pltpu.MemorySpace.SMEM),
            pl.BlockSpec(memory_space=pltpu.MemorySpace.SMEM),
        ],
        out_specs=pl.BlockSpec((3, tile_h, tile_w), lambda i, j: (0, i, j)),
        scratch_shapes=[
            pltpu.VMEM((tile_h, tile_w), jnp.float32),   # z-buffer
            pltpu.VMEM((tile_h, tile_w), jnp.float32),   # winning-face shade
        ],
        compiler_params=pltpu.CompilerParams(
            dimension_semantics=("parallel", "parallel")),
        cost_estimate=cost,
    )(face_data, bbox)


class KaolinRenderer:
    # Hard-coded in the reference forward: face color = BASE_COLOR * lambert.
    BASE_COLOR = (1.0, 0.0, 0.0)

    def __init__(self, width=640, height=480, fov=60.0):
        self.width = width
        self.height = height
        self.fov = fov  # unused in forward (projection built from K); kept for parity

    def build_projection_from_K(self, K):
        fx, fy = K[0, 0], K[1, 1]
        cx, cy = K[0, 2], K[1, 2]
        w, h = float(self.width), float(self.height)
        zero = jnp.zeros((), jnp.float32)
        proj = jnp.stack(
            [
                jnp.stack([2.0 * fx / w, zero, (w - 2.0 * cx) / w, zero]),
                jnp.stack([zero, 2.0 * fy / h, (h - 2.0 * cy) / h, zero]),
                jnp.array([0.0, 0.0, -1.0, -0.2], jnp.float32),
                jnp.array([0.0, 0.0, -1.0, 0.0], jnp.float32),
            ]
        )
        return proj

    def __call__(self, verts, faces, R_obj, T_obj, K, cam_extrinsics):
        verts = jnp.asarray(verts, jnp.float32)          # (V, 3)
        faces = jnp.asarray(faces, jnp.int32)            # (F, 3)
        R_obj = jnp.asarray(R_obj, jnp.float32)          # (3, 3)
        T_obj = jnp.asarray(T_obj, jnp.float32)          # (3,)
        K = jnp.asarray(K, jnp.float32)                  # (3, 3)

        # verts_world = verts @ R_obj^T + T_obj
        verts_world = verts @ R_obj.T + T_obj[None, :]   # (V, 3)

        R_w2c = jnp.asarray(cam_extrinsics["R_w2c"], jnp.float32)
        t_w2c = jnp.asarray(cam_extrinsics["t_w2c"], jnp.float32)
        world2cam = jnp.eye(4, dtype=jnp.float32)
        world2cam = world2cam.at[:3, :3].set(R_w2c).at[:3, 3].set(t_w2c)

        proj = self.build_projection_from_K(K)
        VP = proj @ world2cam                            # (4, 4)

        ones = jnp.ones((verts_world.shape[0], 1), jnp.float32)
        verts_world_homo = jnp.concatenate([verts_world, ones], axis=-1)  # (V, 4)
        verts_cam = verts_world_homo @ VP.T              # (V, 4)
        # NOTE: matches the reference module: divide by the (clamped) z row
        # (not the w row) and no near-plane clipping; depth test below is
        # "larger NDC z wins" on the resulting values.
        verts_cam_z = jnp.clip(verts_cam[:, 2:3], 1e-8, None)
        verts_ndc = verts_cam[:, :3] / verts_cam_z
        verts_ndc = jnp.nan_to_num(verts_ndc, nan=0.0, posinf=0.0, neginf=0.0)

        fv = verts_ndc[faces]                            # (F, 3, 3)
        face_xy = fv[:, :, :2]                           # (F, 3, 2)
        face_z = fv[:, :, 2]                             # (F, 3)

        # Lambert shading from camera-space face normals.
        verts_cam_space = verts_world @ R_w2c.T + t_w2c[None, :]
        tri = verts_cam_space[faces]                     # (F, 3, 3)
        v1 = tri[:, 1] - tri[:, 0]
        v2 = tri[:, 2] - tri[:, 0]
        normals = jnp.cross(v1, v2)
        normals = normals / (jnp.linalg.norm(normals, axis=-1, keepdims=True) + 1e-8)
        light_dir = jnp.array([0.0, 0.0, 1.0], jnp.float32)
        lambert = jnp.clip(normals @ light_dir, 0.0, None)     # (F,) shade

        # --- Per-face affine plane coefficients (O(F) wrapper work). ---------
        x0, y0 = face_xy[:, 0, 0], face_xy[:, 0, 1]
        x1, y1 = face_xy[:, 1, 0], face_xy[:, 1, 1]
        x2, y2 = face_xy[:, 2, 0], face_xy[:, 2, 1]
        z0, z1, z2 = face_z[:, 0], face_z[:, 1], face_z[:, 2]

        a0, b0, c0 = y1 - y2, x2 - x1, x1 * y2 - x2 * y1
        a1, b1, c1 = y2 - y0, x0 - x2, x2 * y0 - x0 * y2
        a2, b2, c2 = y0 - y1, x1 - x0, x0 * y1 - x1 * y0
        area = a0 * x0 + b0 * y0 + c0                    # signed area (x2 scale)
        valid = jnp.abs(area) > 1e-10
        inv_area = jnp.where(valid, 1.0 / jnp.where(valid, area, 1.0), 0.0)

        # 1/signed-area folded in => normalized barycentrics (orientation-
        # independent inside test).  Edge 2 is NOT shipped: the kernel derives
        # it as 1 - e0 - e1, but its coefficients are still needed for the
        # depth plane.
        e0x, e0y, e0c = a0 * inv_area, b0 * inv_area, c0 * inv_area
        e1x, e1y, e1c = a1 * inv_area, b1 * inv_area, c1 * inv_area
        e2x, e2y, e2c = a2 * inv_area, b2 * inv_area, c2 * inv_area
        d_x = e0x * z0 + e1x * z1 + e2x * z2
        d_y = e0y * z0 + e1y * z1 + e2y * z2
        d_c = e0c * z0 + e1c * z1 + e2c * z2
        # Degenerate faces: coefficients are zero; force edge-0's constant
        # negative so min(e0, e1, 1-e0-e1) < 0 at every pixel (never drawn).
        e0c = jnp.where(valid, e0c, -1.0)

        num_faces = faces.shape[0]
        face_data = jnp.stack(
            [e0x, e0y, e0c, e1x, e1y, e1c, d_x, d_y, d_c, lambert], axis=-1
        ).astype(jnp.float32).reshape(num_faces * NFEAT)   # (F*NFEAT,) SMEM table

        # --- Conservative per-face row AND column pixel bounding boxes. ------
        hf, wf = float(self.height), float(self.width)
        y_lo = face_xy[:, :, 1].min(axis=-1)
        y_hi = face_xy[:, :, 1].max(axis=-1)
        x_lo = face_xy[:, :, 0].min(axis=-1)
        x_hi = face_xy[:, :, 0].max(axis=-1)
        row_lo = jnp.clip(jnp.floor((1.0 - y_hi) * (hf / 2.0) - 0.5) - 1.0, -1.0, hf)
        row_hi = jnp.clip(jnp.ceil((1.0 - y_lo) * (hf / 2.0) - 0.5) + 1.0, -1.0, hf)
        col_lo = jnp.clip(jnp.floor((x_lo + 1.0) * (wf / 2.0) - 0.5) - 1.0, -1.0, wf)
        col_hi = jnp.clip(jnp.ceil((x_hi + 1.0) * (wf / 2.0) - 0.5) + 1.0, -1.0, wf)
        # Degenerate faces get an empty range (extra safety on top of e0c=-1).
        row_lo = jnp.where(valid, row_lo, 2.0 * hf)
        row_hi = jnp.where(valid, row_hi, -2.0)
        col_lo = jnp.where(valid, col_lo, 2.0 * wf)
        col_hi = jnp.where(valid, col_hi, -2.0)
        bbox = (
            jnp.stack([row_lo, row_hi, col_lo, col_hi], axis=-1)
            .astype(jnp.int32)
            .reshape(NBBOX * num_faces)
        )

        img_chw = rasterize_pallas(
            face_data, bbox, self.height, self.width, self.BASE_COLOR
        )  # (3, H, W)
        # Keep the module's documented (1, H, W, 3) output layout; this is a
        # small separate XLA transpose outside the (lane-dense) kernel output.
        return jnp.transpose(img_chw, (1, 2, 0))[None]


if __name__ == "__main__":
    key = jax.random.PRNGKey(0)
    k_verts, k_faces = jax.random.split(key)

    V, F = 12, 16
    H, W = 64, 128

    verts = jax.random.normal(k_verts, (V, 3), jnp.float32)
    faces = jax.random.randint(k_faces, (F, 3), 0, V, dtype=jnp.int32)

    theta = 0.3
    R_obj = jnp.array(
        [
            [math.cos(theta), -math.sin(theta), 0.0],
            [math.sin(theta), math.cos(theta), 0.0],
            [0.0, 0.0, 1.0],
        ],
        jnp.float32,
    )
    T_obj = jnp.array([0.0, 0.0, -4.0], jnp.float32)  # push object in front of camera
    K = jnp.array(
        [[100.0, 0.0, W / 2.0], [0.0, 100.0, H / 2.0], [0.0, 0.0, 1.0]], jnp.float32
    )
    cam_extrinsics = {
        "R_w2c": jnp.eye(3, dtype=jnp.float32),
        "t_w2c": jnp.zeros((3,), jnp.float32),
    }

    renderer = KaolinRenderer(width=W, height=H, fov=60.0)
    out = renderer(verts, faces, R_obj, T_obj, K, cam_extrinsics)
    out = jax.block_until_ready(out)

    assert out.shape == (1, H, W, 3), out.shape
    assert out.dtype == jnp.float32
    assert bool(jnp.all(jnp.isfinite(out)))
    print("KERNEL_OK")
</pallas_src>

<mosaic_0001>
module attributes {stable_mosaic.version = 11 : i64} {
  func.func @kernel(%arg0: i32, %arg1: i32, %arg2: memref<160xf32, #tpu.memory_space<smem>>, %arg3: memref<64xi32, #tpu.memory_space<smem>>, %arg4: memref<3x32x128xf32, #tpu.memory_space<vmem>>, %arg5: memref<32x128xf32, #tpu.memory_space<vmem>>, %arg6: memref<32x128xf32, #tpu.memory_space<vmem>>) attributes {dimension_semantics = [#tpu.dimension_semantics<parallel>, #tpu.dimension_semantics<parallel>], iteration_bounds = array<i64: 2, 1>, scalar_prefetch = 0 : i64, scratch_operands = 2 : i64, tpu.core_type = #tpu.core_type<tc>, window_params = [{transform_indices = @transform_0, window_bounds = array<i64: 160>}, {transform_indices = @transform_1, window_bounds = array<i64: 64>}, {transform_indices = @transform_2, window_bounds = array<i64: 3, 32, 128>}]} {
    %c32_i32 = arith.constant 32 : i32
    %0 = arith.muli %arg0, %c32_i32 : i32
    %c128_i32 = arith.constant 128 : i32
    %1 = arith.muli %arg1, %c128_i32 : i32
    %2 = tpu.iota {dimensions = array<i32: 0>} : vector<32x128xi32>
    %3 = vector.broadcast %0 : i32 to vector<32x128xi32>
    %4 = arith.addi %3, %2 : vector<32x128xi32>
    %5 = arith.sitofp %4 : vector<32x128xi32> to vector<32x128xf32>
    %6 = tpu.iota {dimensions = array<i32: 1>} : vector<32x128xi32>
    %7 = vector.broadcast %1 : i32 to vector<32x128xi32>
    %8 = arith.addi %7, %6 : vector<32x128xi32>
    %9 = arith.sitofp %8 : vector<32x128xi32> to vector<32x128xf32>
    %cst = arith.constant 5.000000e-01 : f32
    %10 = vector.broadcast %cst : f32 to vector<32x128xf32>
    %11 = arith.addf %9, %10 : vector<32x128xf32>
    %cst_0 = arith.constant 1.562500e-02 : f32
    %12 = vector.broadcast %cst_0 : f32 to vector<32x128xf32>
    %13 = arith.mulf %11, %12 : vector<32x128xf32>
    %cst_1 = arith.constant 1.000000e+00 : f32
    %14 = vector.broadcast %cst_1 : f32 to vector<32x128xf32>
    %15 = arith.subf %13, %14 : vector<32x128xf32>
    %cst_2 = arith.constant 5.000000e-01 : f32
    %16 = vector.broadcast %cst_2 : f32 to vector<32x128xf32>
    %17 = arith.addf %5, %16 : vector<32x128xf32>
    %cst_3 = arith.constant 3.125000e-02 : f32
    %18 = vector.broadcast %cst_3 : f32 to vector<32x128xf32>
    %19 = arith.mulf %17, %18 : vector<32x128xf32>
    %cst_4 = arith.constant 1.000000e+00 : f32
    %20 = vector.broadcast %cst_4 : f32 to vector<32x128xf32>
    %21 = arith.subf %20, %19 : vector<32x128xf32>
    %cst_5 = arith.constant 0xFF800000 : f32
    %22 = vector.broadcast %cst_5 : f32 to vector<32x128xf32>
    %c0 = arith.constant 0 : index
    %c0_6 = arith.constant 0 : index
    %23 = vector.load %arg5[%c0, %c0_6] : memref<32x128xf32, #tpu.memory_space<vmem>>, vector<32x128xf32>
    tpu.vector_store %arg5[%c0, %c0_6], %22 {strides = array<i32>} : memref<32x128xf32, #tpu.memory_space<vmem>>, vector<32x128xf32>,
    %cst_7 = arith.constant 0.000000e+00 : f32
    %24 = vector.broadcast %cst_7 : f32 to vector<32x128xf32>
    %c0_8 = arith.constant 0 : index
    %c0_9 = arith.constant 0 : index
    %25 = vector.load %arg6[%c0_8, %c0_9] : memref<32x128xf32, #tpu.memory_space<vmem>>, vector<32x128xf32>
    tpu.vector_store %arg6[%c0_8, %c0_9], %24 {strides = array<i32>} : memref<32x128xf32, #tpu.memory_space<vmem>>, vector<32x128xf32>,
    %c31_i32 = arith.constant 31 : i32
    %26 = arith.addi %0, %c31_i32 : i32
    %c127_i32 = arith.constant 127 : i32
    %27 = arith.addi %1, %c127_i32 : i32
    %c0_i32 = arith.constant 0 : i32
    %c16_i32 = arith.constant 16 : i32
    %28 = arith.addi %c0_i32, %c16_i32 : i32
    %c1_i32 = arith.constant 1 : i32
    scf.for %arg7 = %c0_i32 to %28 step %c1_i32  : i32 {
      %c1_i32_23 = arith.constant 1 : i32
      %45 = arith.muli %arg7, %c1_i32_23 : i32
      %c0_i32_24 = arith.constant 0 : i32
      %46 = arith.addi %c0_i32_24, %45 : i32
      %c4_i32 = arith.constant 4 : i32
      %47 = arith.muli %c4_i32, %46 : i32
      %c0_i32_25 = arith.constant 0 : i32
      %48 = arith.addi %47, %c0_i32_25 : i32
      %49 = arith.index_cast %48 : i32 to index
      %50 = memref.load %arg3[%49] : memref<64xi32, #tpu.memory_space<smem>>
      %c1_i32_26 = arith.constant 1 : i32
      %51 = arith.addi %47, %c1_i32_26 : i32
      %52 = arith.index_cast %51 : i32 to index
      %53 = memref.load %arg3[%52] : memref<64xi32, #tpu.memory_space<smem>>
      %c2_i32 = arith.constant 2 : i32
      %54 = arith.addi %47, %c2_i32 : i32
      %55 = arith.index_cast %54 : i32 to index
      %56 = memref.load %arg3[%55] : memref<64xi32, #tpu.memory_space<smem>>
      %c3_i32 = arith.constant 3 : i32
      %57 = arith.addi %47, %c3_i32 : i32
      %58 = arith.index_cast %57 : i32 to index
      %59 = memref.load %arg3[%58] : memref<64xi32, #tpu.memory_space<smem>>
      %60 = arith.cmpi sge, %53, %0 : i32
      %61 = arith.cmpi sle, %50, %26 : i32
      %62 = arith.andi %60, %61 : i1
      %63 = arith.cmpi sge, %59, %1 : i32
      %64 = arith.andi %62, %63 : i1
      %65 = arith.cmpi sle, %56, %27 : i32
      %66 = arith.andi %64, %65 : i1
      %67 = arith.extui %66 : i1 to i32
      %c0_i32_27 = arith.constant 0 : i32
      %68 = arith.cmpi ne, %67, %c0_i32_27 : i32
      scf.if %68 {
        %c10_i32 = arith.constant 10 : i32
        %69 = arith.muli %46, %c10_i32 : i32
        %c0_i32_28 = arith.constant 0 : i32
        %70 = arith.addi %69, %c0_i32_28 : i32
        %71 = arith.index_cast %70 : i32 to index
        %72 = memref.load %arg2[%71] : memref<160xf32, #tpu.memory_space<smem>>
        %73 = vector.broadcast %72 : f32 to vector<32x128xf32>
        %74 = arith.mulf %73, %15 : vector<32x128xf32>
        %c1_i32_29 = arith.constant 1 : i32
        %75 = arith.addi %69, %c1_i32_29 : i32
        %76 = arith.index_cast %75 : i32 to index
        %77 = memref.load %arg2[%76] : memref<160xf32, #tpu.memory_space<smem>>
        %78 = vector.broadcast %77 : f32 to vector<32x128xf32>
        %79 = arith.mulf %78, %21 : vector<32x128xf32>
        %80 = arith.addf %74, %79 : vector<32x128xf32>
        %c2_i32_30 = arith.constant 2 : i32
        %81 = arith.addi %69, %c2_i32_30 : i32
        %82 = arith.index_cast %81 : i32 to index
        %83 = memref.load %arg2[%82] : memref<160xf32, #tpu.memory_space<smem>>
        %84 = vector.broadcast %83 : f32 to vector<32x128xf32>
        %85 = arith.addf %80, %84 : vector<32x128xf32>
        %c3_i32_31 = arith.constant 3 : i32
        %86 = arith.addi %69, %c3_i32_31 : i32
        %87 = arith.index_cast %86 : i32 to index
        %88 = memref.load %arg2[%87] : memref<160xf32, #tpu.memory_space<smem>>
        %89 = vector.broadcast %88 : f32 to vector<32x128xf32>
        %90 = arith.mulf %89, %15 : vector<32x128xf32>
        %c4_i32_32 = arith.constant 4 : i32
        %91 = arith.addi %69, %c4_i32_32 : i32
        %92 = arith.index_cast %91 : i32 to index
        %93 = memref.load %arg2[%92] : memref<160xf32, #tpu.memory_space<smem>>
        %94 = vector.broadcast %93 : f32 to vector<32x128xf32>
        %95 = arith.mulf %94, %21 : vector<32x128xf32>
        %96 = arith.addf %90, %95 : vector<32x128xf32>
        %c5_i32 = arith.constant 5 : i32
        %97 = arith.addi %69, %c5_i32 : i32
        %98 = arith.index_cast %97 : i32 to index
        %99 = memref.load %arg2[%98] : memref<160xf32, #tpu.memory_space<smem>>
        %100 = vector.broadcast %99 : f32 to vector<32x128xf32>
        %101 = arith.addf %96, %100 : vector<32x128xf32>
        %cst_33 = arith.constant 1.000000e+00 : f32
        %102 = vector.broadcast %cst_33 : f32 to vector<32x128xf32>
        %103 = arith.subf %102, %85 : vector<32x128xf32>
        %104 = arith.subf %103, %101 : vector<32x128xf32>
        %c6_i32 = arith.constant 6 : i32
        %105 = arith.addi %69, %c6_i32 : i32
        %106 = arith.index_cast %105 : i32 to index
        %107 = memref.load %arg2[%106] : memref<160xf32, #tpu.memory_space<smem>>
        %108 = vector.broadcast %107 : f32 to vector<32x128xf32>
        %109 = arith.mulf %108, %15 : vector<32x128xf32>
        %c7_i32 = arith.constant 7 : i32
        %110 = arith.addi %69, %c7_i32 : i32
        %111 = arith.index_cast %110 : i32 to index
        %112 = memref.load %arg2[%111] : memref<160xf32, #tpu.memory_space<smem>>
        %113 = vector.broadcast %112 : f32 to vector<32x128xf32>
        %114 = arith.mulf %113, %21 : vector<32x128xf32>
        %115 = arith.addf %109, %114 : vector<32x128xf32>
        %c8_i32 = arith.constant 8 : i32
        %116 = arith.addi %69, %c8_i32 : i32
        %117 = arith.index_cast %116 : i32 to index
        %118 = memref.load %arg2[%117] : memref<160xf32, #tpu.memory_space<smem>>
        %119 = vector.broadcast %118 : f32 to vector<32x128xf32>
        %120 = arith.addf %115, %119 : vector<32x128xf32>
        %c0_34 = arith.constant 0 : index
        %c0_35 = arith.constant 0 : index
        %121 = vector.load %arg5[%c0_34, %c0_35] : memref<32x128xf32, #tpu.memory_space<vmem>>, vector<32x128xf32>
        %122 = arith.minimumf %85, %101 : vector<32x128xf32>
        %123 = arith.minimumf %122, %104 : vector<32x128xf32>
        %cst_36 = arith.constant 0.000000e+00 : f32
        %124 = vector.broadcast %cst_36 : f32 to vector<32x128xf32>
        %125 = arith.cmpf oge, %123, %124 : vector<32x128xf32>
        %126 = arith.cmpf ogt, %120, %121 : vector<32x128xf32>
        %127 = arith.andi %125, %126 : vector<32x128xi1>
        %128 = arith.select %127, %120, %121 : vector<32x128xi1>, vector<32x128xf32>
        %c0_37 = arith.constant 0 : index
        %c0_38 = arith.constant 0 : index
        %129 = vector.load %arg5[%c0_37, %c0_38] : memref<32x128xf32, #tpu.memory_space<vmem>>, vector<32x128xf32>
        tpu.vector_store %arg5[%c0_37, %c0_38], %128 {strides = array<i32>} : memref<32x128xf32, #tpu.memory_space<vmem>>, vector<32x128xf32>,
        %c9_i32 = arith.constant 9 : i32
        %130 = arith.addi %69, %c9_i32 : i32
        %131 = arith.index_cast %130 : i32 to index
        %132 = memref.load %arg2[%131] : memref<160xf32, #tpu.memory_space<smem>>
        %c0_39 = arith.constant 0 : index
        %c0_40 = arith.constant 0 : index
        %133 = vector.load %arg6[%c0_39, %c0_40] : memref<32x128xf32, #tpu.memory_space<vmem>>, vector<32x128xf32>
        %134 = vector.broadcast %132 : f32 to vector<32x128xf32>
        %135 = arith.select %127, %134, %133 : vector<32x128xi1>, vector<32x128xf32>
        %c0_41 = arith.constant 0 : index
        %c0_42 = arith.constant 0 : index
        %136 = vector.load %arg6[%c0_41, %c0_42] : memref<32x128xf32, #tpu.memory_space<vmem>>, vector<32x128xf32>
        tpu.vector_store %arg6[%c0_41, %c0_42], %135 {strides = array<i32>} : memref<32x128xf32, #tpu.memory_space<vmem>>, vector<32x128xf32>,
      } else {
      }
    }
    %c16_i32_10 = arith.constant 16 : i32
    %c0_11 = arith.constant 0 : index
    %c0_12 = arith.constant 0 : index
    %29 = vector.load %arg6[%c0_11, %c0_12] : memref<32x128xf32, #tpu.memory_space<vmem>>, vector<32x128xf32>
    %cst_13 = arith.constant 1.000000e+00 : f32
    %30 = vector.broadcast %cst_13 : f32 to vector<32x128xf32>
    %31 = arith.mulf %29, %30 : vector<32x128xf32>
    %c0_14 = arith.constant 0 : index
    %c0_15 = arith.constant 0 : index
    %c0_16 = arith.constant 0 : index
    %32 = vector.load %arg4[%c0_14, %c0_15, %c0_16] : memref<3x32x128xf32, #tpu.memory_space<vmem>>, vector<1x32x128xf32>
    %33 = vector.shape_cast %32 : vector<1x32x128xf32> to vector<32x128xf32>
    %34 = vector.shape_cast %31 : vector<32x128xf32> to vector<1x32x128xf32>
    tpu.vector_store %arg4[%c0_14, %c0_15, %c0_16], %34 {strides = array<i32>} : memref<3x32x128xf32, #tpu.memory_space<vmem>>, vector<1x32x128xf32>,
    %cst_17 = arith.constant 0.000000e+00 : f32
    %35 = vector.broadcast %cst_17 : f32 to vector<32x128xf32>
    %36 = arith.mulf %29, %35 : vector<32x128xf32>
    %c1 = arith.constant 1 : index
    %c0_18 = arith.constant 0 : index
    %c0_19 = arith.constant 0 : index
    %37 = vector.load %arg4[%c1, %c0_18, %c0_19] : memref<3x32x128xf32, #tpu.memory_space<vmem>>, vector<1x32x128xf32>
    %38 = vector.shape_cast %37 : vector<1x32x128xf32> to vector<32x128xf32>
    %39 = vector.shape_cast %36 : vector<32x128xf32> to vector<1x32x128xf32>
    tpu.vector_store %arg4[%c1, %c0_18, %c0_19], %39 {strides = array<i32>} : memref<3x32x128xf32, #tpu.memory_space<vmem>>, vector<1x32x128xf32>,
    %cst_20 = arith.constant 0.000000e+00 : f32
    %40 = vector.broadcast %cst_20 : f32 to vector<32x128xf32>
    %41 = arith.mulf %29, %40 : vector<32x128xf32>
    %c2 = arith.constant 2 : index
    %c0_21 = arith.constant 0 : index
    %c0_22 = arith.constant 0 : index
    %42 = vector.load %arg4[%c2, %c0_21, %c0_22] : memref<3x32x128xf32, #tpu.memory_space<vmem>>, vector<1x32x128xf32>
    %43 = vector.shape_cast %42 : vector<1x32x128xf32> to vector<32x128xf32>
    %44 = vector.shape_cast %41 : vector<32x128xf32> to vector<1x32x128xf32>
    tpu.vector_store %arg4[%c2, %c0_21, %c0_22], %44 {strides = array<i32>} : memref<3x32x128xf32, #tpu.memory_space<vmem>>, vector<1x32x128xf32>,
    return
  }
  func.func @transform_0(%arg0: i32, %arg1: i32) -> i32 {
    %c0_i32 = arith.constant 0 : i32
    %c0_i32_0 = arith.constant 0 : i32
    return %c0_i32 : i32
  }
  func.func @transform_1(%arg0: i32, %arg1: i32) -> i32 {
    %c0_i32 = arith.constant 0 : i32
    %c0_i32_0 = arith.constant 0 : i32
    return %c0_i32 : i32
  }
  func.func @transform_2(%arg0: i32, %arg1: i32) -> (i32, i32, i32) {
    %c0_i32 = arith.constant 0 : i32
    %c0_i32_0 = arith.constant 0 : i32
    return %c0_i32, %arg0, %arg1 : i32, i32, i32
  }
}

</mosaic_0001>

<bundles_post_ra>
// kernel: tpu_custom_call.1
= control target key start
LH: loop header
LB: loop body
LE: loop exit
PB: predicated region body
PF: predicated region fallthrough
CT: control target
= control target key end

     0   :  { %s972_s0 = inlined_call_operand.hbm [shape: f32[160], index: 0, kind: input, shape index: {}]   ;;  %s973_s1 = inlined_call_operand.hbm [shape: s32[64], index: 1, kind: input, shape index: {}]   ;;  %s974_s2 = inlined_call_operand.hbm [shape: f32[3,64,128], index: 2, kind: output, shape index: {}]  }
   0x1   :  { %976 = sst [smem:[#allocation15_spill]] %s972_s0 }
   0x2   :  { %7 = vsyncpa [#allocation6], 0 }
   0x3   :  { %8 = vsyncpa [#allocation8], 0 }
   0x4   :  { %9 = vsyncpa [#allocation5], 0 }
   0x5   :  { %11 = vsyncpa [#allocation5 + $0x1], 0  ;;  %s754_s9 = smov 0   ;;  %s756_s10 = smov 0  }
   0x6   :  { %s758_s11 = smov 0   ;;  %s760_s12 = smov 0  }
   0x7   :  { %s762_s13 = smov 0   ;;  %s764_s14 = smov 0  }
   0x8 LB: > { %s506_s15 = sadd.s32 4294967295, %s722_s14   ;;  %s507_s16 = sadd.s32 4294967294, %s722_s14   ;;  %s722_s14 = sphi %s764_s14, %s17_s14   ;;  %s718_s13 = sphi %s762_s13, %s991_s13   ;;  %s714_s12 = sphi %s760_s12, %s990_s12   ;;  %s710_s11 = sphi %s758_s11, %s989_s11   ;;  %s706_s10 = sphi %s756_s10, %s988_s10   ;;  %s702_s9 = sphi %s754_s9, %s987_s9  }
   0x9   : > { %s29_s17 = sadd.s32 1, %s718_s13  ;;  %s80_s18 = sadd.s32 1, %s710_s11 }
   0xa   : > { %p31_p0 = scmp.ge.s32.totalorder %s29_s17, 2  ;;  %p90_p1 = scmp.ne.s32.totalorder %s710_s11, %s706_s10 }
   0xb   : > { %p91_p2 = scmp.eq.s32.totalorder %s506_s15, 1  ;;  %p96_p3 = scmp.ne.s32.totalorder %s706_s10, %s702_s9 }
   0xc   : > { %s993_s17 = smov (%p31_p0, %s29_s17), 0  ;;  %p97_p5 = scmp.eq.s32.totalorder %s507_s16, 1 }
   0xd   : > { %p794_p4 = por %p91_p2, %p90_p1  ;;  %s75_s20 = ssub.s32 %s718_s13, %s993_s17 }
   0xe   : > { %p508_p6 = scmp.ge.s32.totalorder %s722_s14, 1  ;;  %p78_p7 = scmp.eq.s32.totalorder %s75_s20, 0 }
   0xf   : > { %p801_p8 = por %p97_p5, %p96_p3  ;;  %p104_p9 = scmp.lt.s32.totalorder %s722_s14, 3 }
  0x10   : > { %s807_s22 = scalar_select %p78_p7, %s710_s11, %s80_s18  }
  0x11   : > { %p105_p10 = pnand %p508_p6, %p104_p9  ;;  %p809_p11 = scmp.eq.s32.totalorder %s506_s15, 0 }
  0x12   : > { %s980_s0 = sld [smem:[#allocation15_spill]]  ;;  %s126_s29 = sshll.u32 %s973_s1, 4  ;;  %s127_s29 = int_to_ptr.hbm [resolvable:$true] %s126_s29 }
  0x13   : > { %p547_p12 = pneg %p105_p10  ;;  %s728_s30 = smov [#allocation4]  }
  0x14   : > { %s729_s3 = smov [#allocation7]  }
  0x15   : > { %p548_p13 = pnand %p809_p11, %p547_p12  ;;  %139 = sbr.rel (%p105_p10) target bundleno = 127 (0x7f), region = 28 }
  0x17   : > { %553 = dma.hbm_to_smem (!%p548_p13), %s127_s29, 16, %s729_s3, [#allocation8]  }
  0x18   : > { %s116_s26 = sshll.u32 %s980_s0, 4  ;;  %s117_s26 = int_to_ptr.hbm [resolvable:$true] %s116_s26 }
  0x19   : > { %550 = dma.hbm_to_smem (!%p548_p13), %s117_s26, 32, %s728_s30, [#allocation6]  }
  0x1a   : > { %689 = dma.done.wait (%p809_p11), [#allocation6], 32  }
  0x1b   : > { %691 = vsyncadd (%p809_p11), [#allocation6], 4294967264 }
  0x1c   : > { %693 = dma.done.wait (%p809_p11), [#allocation8], 16  }
  0x1d   : > { %695 = vsyncadd (%p809_p11), [#allocation8], 4294967280 }
  0x1e   : > { %151 = sfence }
  0x1f   : > { %s975_s4 = sand.u32 1, %s706_s10   ;;  %s831_s5 = sshll.u32 %s714_s12, 5  ;;  %v166_v0 = vlaneseq  ;;  %v730_v2 = vmov -inf   ;;  %v731_v10 = vmov 0.0  }
  0x20   : > { %s835_s6 = smul.u32 96, %s975_s4  ;;  %v171_v1 = vstv %s831_s5  ;;  %200 = vst [vmem:[#allocation2 + $0x10] sm:$0xff] %v730_v2  ;;  %s852_s12 = smov 0  }
  0x21   : > { %v167_v3 = vshrl.u32 %v166_v0, 7  ;;  %v181_v4 = vand.u32 127, %v166_v0  ;;  %201 = vst [vmem:[#allocation2] sm:$0xff] %v730_v2 }
  0x22   : > { %202 = vst [vmem:[#allocation2 + $0x18] sm:$0xff] %v730_v2  ;;  %s850_s8 = scalar_lea.vmem [#allocation9], %s835_s6 }
  0x23   : > { %v168_v5 = vadd.s32 8, %v167_v3  ;;  %v169_v6 = vadd.s32 16, %v167_v3  ;;  %v170_v7 = vadd.s32 24, %v167_v3  ;;  %v172_v8 = vadd.s32 %v171_v1, %v167_v3  ;;  %203 = vst [vmem:[#allocation2 + $0x8] sm:$0xff] %v730_v2 }
  0x24   : > { %v184_v9 = vcvt.s32.f32 %v181_v4  ;;  %204 = vst [vmem:[#allocation3] sm:$0xff] %v731_v10 }
  0x25   : > { %v173_v11 = vadd.s32 %v171_v1, %v168_v5  ;;  %v174_v12 = vadd.s32 %v171_v1, %v169_v6  ;;  %v175_v13 = vadd.s32 %v171_v1, %v170_v7  ;;  %v176_v14 = vcvt.s32.f32 %v172_v8  ;;  %205 = vst [vmem:[#allocation3 + $0x18] sm:$0xff] %v731_v10 }
  0x26   : > { %v185_v15 = vadd.f32 0.5, %v184_v9  ;;  %206 = vst [vmem:[#allocation3 + $0x8] sm:$0xff] %v731_v10 }
  0x27   : > { %v177_v16 = vcvt.s32.f32 %v173_v11  ;;  %v178_v17 = vcvt.s32.f32 %v174_v12  ;;  %v179_v18 = vcvt.s32.f32 %v175_v13  ;;  %v188_v19 = vadd.f32 0.5, %v176_v14  ;;  %207 = vst [vmem:[#allocation3 + $0x10] sm:$0xff] %v731_v10 }
  0x28   : > { %v186_v20 = vmul.f32 0.015625, %v185_v15 }
  0x29   : > { %v189_v21 = vadd.f32 0.5, %v177_v16  ;;  %v190_v22 = vadd.f32 0.5, %v178_v17  ;;  %v191_v23 = vadd.f32 0.5, %v179_v18  ;;  %v192_v24 = vmul.f32 0.03125, %v188_v19 }
  0x2a   : > { %v839_v25 = vadd.f32 -1.0, %v186_v20 }
  0x2b   : > { %v193_v26 = vmul.f32 0.03125, %v189_v21  ;;  %v194_v27 = vmul.f32 0.03125, %v190_v22  ;;  %v195_v28 = vmul.f32 0.03125, %v191_v23  ;;  %v841_v29 = vsub.f32 1.0, %v192_v24 }
  0x2d   : > { %v843_v30 = vsub.f32 1.0, %v193_v26  ;;  %v845_v31 = vsub.f32 1.0, %v194_v27  ;;  %v847_v32 = vsub.f32 1.0, %v195_v28 }
  0x2e LB: >> { %s516_s15 = sshll.u32 %s726_s12, 2  ;;  %s981_s7 = sadd.s32 31, %s831_s5  ;;  %s726_s12 = sphi %s852_s12, %s215_s12  }
  0x2f   : >> { %s217_s16 = sld [smem:[#allocation7 + %s516_s15]]  ;;  %s218_s18 = sadd.s32 1, %s516_s15 }
  0x30   : >> { %s219_s20 = sld [smem:[#allocation7 + %s218_s18]]  ;;  %s220_s23 = sadd.s32 2, %s516_s15 }
  0x31   : >> { %s222_s24 = sadd.s32 3, %s516_s15  ;;  %s221_s26 = sld [smem:[#allocation7 + %s220_s23]] }
  0x32   : >> { %s223_s25 = sld [smem:[#allocation7 + %s222_s24]] }
  0x35   : >> { %p225_p0 = scmp.le.s32.totalorder %s217_s16, %s981_s7 }
  0x36   : >> { %p224_p1 = scmp.ge.s32.totalorder %s219_s20, %s831_s5 }
  0x37   : >> { %p231_p7 = scmp.le.s32.totalorder %s221_s26, 127 }
  0x38   : >> { %p226_p2 = pnand %p225_p0, %p224_p1  ;;  %p228_p3 = scmp.ge.s32.totalorder %s223_s25, 0 }
  0x3a   : >> { %p227_p5 = pneg %p226_p2 }
  0x3c   : >> { %p229_p6 = pnand %p228_p3, %p227_p5 }
  0x3e   : >> { %p230_p9 = pneg %p229_p6 }
  0x40   : >> { %p232_p10 = pnand %p231_p7, %p230_p9 }
  0x41   : >> { %s862_s27 = smul.u32 (!%p232_p10), 10, %s726_s12 }
  0x42   : >> { %235 = sbr.rel (%p232_p10) target bundleno = 103 (0x67), region = 47 }
  0x43   : >> { %s237_s28 = sld [smem:[#allocation4 + %s862_s27]] (!%p232_p10)  ;;  %s240_s29 = sadd.s32 (!%p232_p10), 1, %s862_s27 }
  0x44   : >> { %s241_s30 = sld [smem:[#allocation4 + %s240_s29]] (!%p232_p10)  ;;  %s251_s3 = sadd.s32 (!%p232_p10), 2, %s862_s27 }
  0x45   : >> { %s252_s6 = sld [smem:[#allocation4 + %s251_s3]] (!%p232_p10)  ;;  %s258_s15 = sadd.s32 (!%p232_p10), 3, %s862_s27 }
  0x46   : >> { %s259_s16 = sld [smem:[#allocation4 + %s258_s15]] (!%p232_p10)  ;;  %s262_s18 = sadd.s32 (!%p232_p10), 4, %s862_s27 }
  0x47   : >> { %s263_s20 = sld [smem:[#allocation4 + %s262_s18]]  ;;  %s273_s23 = sadd.s32 5, %s862_s27  ;;  %v310_v7 = vld [vmem:[#allocation2 + $0x10] sm:$0xff]  ;;  %v311_v12 = vld [vmem:[#allocation2] sm:$0xff]  ;;  %v312_v22 = vld [vmem:[#allocation2 + $0x18] sm:$0xff] }
  0x48   : >> { %s274_s24 = sld [smem:[#allocation4 + %s273_s23]]  ;;  %s288_s25 = sadd.s32 6, %s862_s27  ;;  %v344_v27 = vld [vmem:[#allocation3] sm:$0xff] }
  0x49   : >> { %v238_v33 = vstv %s237_s28  ;;  %s289_s26 = sld [smem:[#allocation4 + %s288_s25]]  ;;  %s292_s7 = sadd.s32 7, %s862_s27 }
  0x4a   : >> { %v239_v34 = vmul.f32 %v839_v25, %v238_v33  ;;  %v242_v35 = vstv %s241_s30  ;;  %s293_s4 = sld [smem:[#allocation4 + %s292_s7]]  ;;  %s303_s0 = sadd.s32 8, %s862_s27 }
  0x4b   : >> { %v243_v36 = vmul.f32 %v242_v35, %v841_v29  ;;  %s304_s29 = sld [smem:[#allocation4 + %s303_s0]]  ;;  %v244_v37 = vmul.f32 %v242_v35, %v843_v30  ;;  %v245_v38 = vmul.f32 %v242_v35, %v845_v31  ;;  %v253_v39 = vstv %s252_s6  ;;  %s342_s0 = sadd.s32 9, %s862_s27 }
  0x4c   : >> { %v260_v40 = vstv %s259_s16  ;;  %v246_v41 = vmul.f32 %v242_v35, %v847_v32  ;;  %s890_s7 = sld [smem:[#allocation4 + %s342_s0]] }
  0x4d   : >> { %v247_v42 = vadd.f32 %v243_v36, %v239_v34  ;;  %v261_v43 = vmul.f32 %v839_v25, %v260_v40  ;;  %v264_v44 = vstv %s263_s20  ;;  %v248_v45 = vadd.f32 %v244_v37, %v239_v34  ;;  %v345_v36 = vld [vmem:[#allocation3 + $0x18] sm:$0xff] }
  0x4e   : >> { %v265_v46 = vmul.f32 %v264_v44, %v841_v29  ;;  %v880_v47 = vstv %s274_s24  ;;  %v266_v48 = vmul.f32 %v264_v44, %v843_v30  ;;  %v249_v49 = vadd.f32 %v245_v38, %v239_v34 }
  0x4f   : >> { %v254_v50 = vadd.f32 %v253_v39, %v247_v42  ;;  %v290_v51 = vstv %s289_s26  ;;  %v255_v52 = vadd.f32 %v253_v39, %v248_v45  ;;  %v267_v53 = vmul.f32 %v264_v44, %v845_v31 }
  0x50   : >> { %v269_v54 = vadd.f32 %v265_v46, %v261_v43  ;;  %v291_v55 = vmul.f32 %v839_v25, %v290_v51  ;;  %v294_v56 = vstv %s293_s4  ;;  %v270_v57 = vadd.f32 %v266_v48, %v261_v43 }
  0x51   : >> { %v280_v58 = vsub.f32 1.0, %v254_v50  ;;  %v295_v59 = vmul.f32 %v294_v56, %v841_v29  ;;  %v305_v60 = vstv %s304_s29  ;;  %v281_v61 = vsub.f32 1.0, %v255_v52 }
  0x52   : >> { %v276_v62 = vadd.f32 %v880_v47, %v269_v54  ;;  %v277_v63 = vadd.f32 %v880_v47, %v270_v57  ;;  %v296_v0 = vmul.f32 %v294_v56, %v843_v30  ;;  %v256_v1 = vadd.f32 %v253_v39, %v249_v49 }
  0x53   : >> { %v299_v2 = vadd.f32 %v295_v59, %v291_v55  ;;  %v271_v3 = vadd.f32 %v267_v53, %v261_v43  ;;  %v297_v4 = vmul.f32 %v294_v56, %v845_v31  ;;  %v250_v5 = vadd.f32 %v246_v41, %v239_v34  ;;  %v346_v41 = vld [vmem:[#allocation3 + $0x8] sm:$0xff] }
  0x54   : >> { %v284_v6 = vsub.f32 %v280_v58, %v276_v62  ;;  %v314_v8 = vmin.f32 %v254_v50, %v276_v62  ;;  %v285_v9 = vsub.f32 %v281_v61, %v277_v63  ;;  %v300_v10 = vadd.f32 %v296_v0, %v291_v55  ;;  %v313_v50 = vld [vmem:[#allocation2 + $0x8] sm:$0xff] }
  0x55   : >> { %v306_v11 = vadd.f32 %v305_v60, %v299_v2  ;;  %v315_v13 = vmin.f32 %v255_v52, %v277_v63  ;;  %v278_v14 = vadd.f32 %v880_v47, %v271_v3  ;;  %v282_v15 = vsub.f32 1.0, %v256_v1 }
  0x56   : >> { %v318_v16 = vmin.f32 %v314_v8, %v284_v6  ;;  %v307_v17 = vadd.f32 %v305_v60, %v300_v10  ;;  %v301_v18 = vadd.f32 %v297_v4, %v291_v55  ;;  %v257_v19 = vadd.f32 %v253_v39, %v250_v5 }
  0x57   : >> { %vm326_vm0 = vcmp.gt.f32.partialorder %v306_v11, %v310_v7  ;;  %v319_v20 = vmin.f32 %v315_v13, %v285_v9  ;;  %v286_v21 = vsub.f32 %v282_v15, %v278_v14  ;;  %v316_v23 = vmin.f32 %v256_v1, %v278_v14 }
  0x58   : >> { %vm322_vm1 = vcmp.ge.f32.partialorder %v318_v16, 0.0  ;;  %vm327_vm2 = vcmp.gt.f32.partialorder %v307_v17, %v311_v12  ;;  %v308_v24 = vadd.f32 %v305_v60, %v301_v18  ;;  %v268_v26 = vmul.f32 %v264_v44, %v847_v32 }
  0x59   : >> { %vm895_vm3 = vmand %vm322_vm1, %vm326_vm0  ;;  %vm323_vm4 = vcmp.ge.f32.partialorder %v319_v20, 0.0  ;;  %v320_v33 = vmin.f32 %v316_v23, %v286_v21  ;;  %v283_v34 = vsub.f32 1.0, %v257_v19  ;;  %v298_v35 = vmul.f32 %v294_v56, %v847_v32 }
  0x5a   : >> { %v334_v37 = vsel %vm895_vm3, %v306_v11, %v310_v7  ;;  %vm902_vm5 = vmand %vm323_vm4, %vm327_vm2  ;;  %vm328_vm6 = vcmp.gt.f32.partialorder %v308_v24, %v312_v22  ;;  %v272_v39 = vadd.f32 %v268_v26, %v261_v43  ;;  %v348_v40 = vstv %s890_s7 }
  0x5b   : >> { %338 = vst [vmem:[#allocation2 + $0x10] sm:$0xff] %v334_v37  ;;  %v335_v42 = vsel %vm902_vm5, %v307_v17, %v311_v12  ;;  %vm324_vm7 = vcmp.ge.f32.partialorder %v320_v33, 0.0  ;;  %v302_v44 = vadd.f32 %v298_v35, %v291_v55  ;;  %v349_v45 = vsel %vm895_vm3, %v348_v40, %v344_v27  ;;  %v347_v55 = vld [vmem:[#allocation3 + $0x10] sm:$0xff] }
  0x5c   : >> { %339 = vst [vmem:[#allocation2] sm:$0xff] %v335_v42  ;;  %vm332_vm8 = vmand %vm324_vm7, %vm328_vm6  ;;  %v279_v46 = vadd.f32 %v880_v47, %v272_v39  ;;  %v350_v48 = vsel %vm902_vm5, %v348_v40, %v345_v36 }
  0x5d   : >> { %v336_v49 = vsel %vm332_vm8, %v308_v24, %v312_v22  ;;  %v309_v43 = vadd.f32 %v305_v60, %v302_v44  ;;  %353 = vst [vmem:[#allocation3] sm:$0xff] %v349_v45  ;;  %v351_v51 = vsel %vm332_vm8, %v348_v40, %v346_v41 }
  0x5e   : >> { %340 = vst [vmem:[#allocation2 + $0x18] sm:$0xff] %v336_v49  ;;  %v287_v52 = vsub.f32 %v283_v34, %v279_v46  ;;  %v317_v53 = vmin.f32 %v257_v19, %v279_v46 }
  0x5f   : >> { %354 = vst [vmem:[#allocation3 + $0x18] sm:$0xff] %v350_v48  ;;  %vm329_vm9 = vcmp.gt.f32.partialorder %v309_v43, %v313_v50 }
  0x60   : >> { %v321_v54 = vmin.f32 %v317_v53, %v287_v52  ;;  %355 = vst [vmem:[#allocation3 + $0x8] sm:$0xff] %v351_v51 }
  0x62   : >> { %vm325_vm10 = vcmp.ge.f32.partialorder %v321_v54, 0.0 }
  0x63   : >> { %vm333_vm11 = vmand %vm325_vm10, %vm329_vm9 }
  0x64   : >> { %v337_v56 = vsel %vm333_vm11, %v309_v43, %v313_v50  ;;  %v352_v47 = vsel %vm333_vm11, %v348_v40, %v347_v55 }
  0x65   : >> { %341 = vst [vmem:[#allocation2 + $0x8] sm:$0xff] %v337_v56 }
  0x66   : >> { %356 = vst [vmem:[#allocation3 + $0x10] sm:$0xff] %v352_v47 }
  0x67 PF: >> { %s215_s12 = sadd.s32 1, %s726_s12  }
  0x68   : >> { %p212_p11 = scmp.ge.s32.totalorder %s215_s12, 16  }
  0x69   : > { %v357_v57 = vld [vmem:[#allocation3] sm:$0xff] (%p212_p11)  ;;  %v358_v58 = vld [vmem:[#allocation3 + $0x18] sm:$0xff] (%p212_p11)  ;;  %v359_v60 = vld [vmem:[#allocation3 + $0x8] sm:$0xff] (%p212_p11)  ;;  %s986_s4 = sand.u32 (%p212_p11), 1, %s706_s10  }
  0x6a   : > { %214 = sbr.rel (!%p212_p11) target bundleno = 46 (0x2e), region = 87  ;;  %361 = vst [vmem:[%s850_s8] sm:$0xff] (%p212_p11), %v357_v57  ;;  %v365_v59 = vmul.f32 (%p212_p11), 0.0, %v357_v57  ;;  %v366_v29 = vmul.f32 (%p212_p11), 0.0, %v358_v58  ;;  %v367_v30 = vmul.f32 (%p212_p11), 0.0, %v359_v60  ;;  %s380_s12 = scalar_lea.sflag (%p212_p11), [#allocation5], %s986_s4 }
  0x6b   : > { %362 = vst [vmem:[%s850_s8 + $0x8] sm:$0xff] (%p212_p11), %v358_v58 }
  0x6c   : > { %363 = vst [vmem:[%s850_s8 + $0x10] sm:$0xff] (%p212_p11), %v359_v60 }
  0x6d   : > { %v360_v25 = vld [vmem:[#allocation3 + $0x10] sm:$0xff] (%p212_p11)  ;;  %517 = vst [vmem:[%s850_s8 + $0x20] sm:$0xff] (%p212_p11), %v365_v59 }
  0x6e   : > { %364 = vst [vmem:[%s850_s8 + $0x18] sm:$0xff] (%p212_p11), %v360_v25  ;;  %v368_v31 = vmul.f32 (%p212_p11), 0.0, %v360_v25 }
  0x6f   : > { %521 = vst [vmem:[%s850_s8 + $0x40] sm:$0xff] %v365_v59 }
  0x70   : > { %518 = vst [vmem:[%s850_s8 + $0x28] sm:$0xff] %v366_v29 }
  0x71   : > { %522 = vst [vmem:[%s850_s8 + $0x48] sm:$0xff] %v366_v29 }
  0x72   : > { %519 = vst [vmem:[%s850_s8 + $0x30] sm:$0xff] %v367_v30 }
  0x73   : > { %523 = vst [vmem:[%s850_s8 + $0x50] sm:$0xff] %v367_v30 }
  0x74   : > { %520 = vst [vmem:[%s850_s8 + $0x38] sm:$0xff] %v368_v31 }
  0x75   : > { %524 = vst [vmem:[%s850_s8 + $0x58] sm:$0xff] %v368_v31 }
  0x76   : > { %s392_s30 = scalar_lea.hbm %s974_s2, %s831_s5  ;;  %s403_s3 = sshll.u32 %s850_s8, 4  ;;  %s404_s3 = int_to_ptr.vmem [resolvable:$true] %s403_s3 }
  0x77   : > { %s405_s6 = sshll.u32 %s392_s30, 4  ;;  %s732_s15 = smov 512   ;;  %s406_s6 = int_to_ptr.hbm [resolvable:$true] %s405_s6 }
  0x78   : > { %539 = sst [smem:[#allocation11]] (%p794_p4), %s732_s15  ;;  %s733_s16 = smov 1024  }
  0x79   : > { %540 = sst [smem:[#allocation11 + $0x1]] (%p794_p4), %s733_s16  ;;  %s734_s18 = smov 4  }
  0x7a   : > { %541 = sst [smem:[#allocation11 + $0x2]] (%p794_p4), %s734_s18  ;;  %s735_s20 = smov 128  }
  0x7b   : > { %542 = sst [smem:[#allocation11 + $0x3]] (%p794_p4), %s735_s20  ;;  %s736_s5 = smov 8  }
  0x7c   : > { %543 = sst [smem:[#allocation11 + $0x4]] (%p794_p4), %s735_s20  ;;  %s737_s8 = smov [#allocation10]  }
  0x7d   : > { %544 = sst [smem:[#allocation11 + $0x5]] (%p794_p4), %s736_s5  ;;  %s738_s23 = smov 0  }
  0x7e   : > { %545 = dma.general (%p794_p4), %s404_s3, 1536, %s406_s6, %s380_s12, %s737_s8, [#allocation11], %s738_s23, 0  }
  0x7f PF: > { %p562_p12 = scmp.ge.s32.totalorder %s722_s14, 2  ;;  %s433_s24 = sand.u32 1, %s702_s9  }
  0x80   : > { %s434_s25 = scalar_lea.sflag [#allocation5], %s433_s24 }
  0x81   : > { %p555_p13 = pnand %p562_p12, %p801_p8 }
  0x83   : > { %p556_p0 = pneg %p555_p13 }
  0x85   : > { %697 = dma.done.wait (%p556_p0), %s434_s25, 1536  }
  0x86   : > { %699 = vsyncadd (%p556_p0), %s434_s25, 4294965760  ;;  %s17_s14 = sadd.s32 1, %s722_s14   ;;  %s987_s9 = smov %s706_s10 }
  0x87   : > { %p14_p1 = scmp.ge.s32.totalorder %s17_s14, 4   ;;  %s988_s10 = smov %s710_s11 }
  0x88   : > { %s989_s11 = smov %s807_s22  ;;  %s990_s12 = smov %s718_s13 }
  0x89   : > { %s991_s13 = smov %s993_s17  ;;  %16 = sbr.rel (!%p14_p1) target bundleno = 8 (0x8), region = 98 }
  0x8e   :  { %440 = vsyncpa [#allocation5], 1 }
  0x8f   :  { %442 = vsyncpa [#allocation5 + $0x1], 1 }
  0x90   :  { %443 = vsyncpa [#allocation6], 1 }
  0x91   :  { %445 = vsyncpa [#allocation6 + $0x1], 1 }
  0x92   :  { %446 = vsyncpa [#allocation8], 1 }

</bundles_post_ra>
